<compile_context>
chip_gen: v7x
topology: tpu7x:2x2x1
jax: 0.10.0
libtpu: 0.0.40
codegen_flags: <defaults>
</compile_context>

<pallas_src>
import functools

import jax
import jax.numpy as jnp
from jax import lax
from jax.experimental import pallas as pl
from jax.experimental.pallas import tpu as pltpu

BN_EPS = 1e-5
LANES = 128
VMEM_LIMIT = 32 * 1024 * 1024


def _round_up(x, m):
    return (x + m - 1) // m * m


def _row_tile(h, cap=64):
    """Largest divisor of h that is <= cap (prefer >=2 row tiles when h > 8)."""
    cap = min(cap, h)
    if h > 8:
        cap = min(cap, max(h // 2, 1))
    for d in range(cap, 0, -1):
        if h % d == 0:
            return d
    return h


def _conv_stats_kernel(x_ref, w_ref, conv_ref, stats_ref, *,
                       ksize, rate, th, w_out, cin, cout_pad):
    """Dilated conv for one (batch, row-tile) block + partial BN statistics.

    x_ref    : (1, Hp, Wp, Cin)  padded image of ONE batch element.  Its index
               map is constant in the row-tile axis, so it is DMA'd once per
               image and revisited from VMEM by the inner row tiles.
    w_ref    : (KH*KW*Cin, Cout_pad)
    conv_ref : (1, th, w_out, Cout_pad) f32
    stats_ref: (1, 1, 2, Cout_pad) f32  -- [sum, sum_sq] partials for this tile
    """
    t = pl.program_id(1)
    row0 = pl.multiple_of(t * th, th)

    # Build the im2col LHS for this tile: each tap is sliced directly from the
    # ref (no full-image load, no f32 upcast copy) and the taps are stacked on
    # the contraction dim so the whole tile is ONE MXU matmul.
    taps = []
    for kh in range(ksize):
        for kw in range(ksize):
            taps.append(
                x_ref[0, pl.ds(row0 + kh * rate, th), pl.ds(kw * rate, w_out), :])
    lhs = jnp.concatenate(taps, axis=-1).reshape(th * w_out, ksize * ksize * cin)

    acc = jnp.dot(lhs, w_ref[...], preferred_element_type=jnp.float32)

    conv_ref[...] = acc.reshape(1, th, w_out, cout_pad)

    # One-pass BN statistics (sum / sum of squares), kept in f32.
    ssum = jnp.sum(acc, axis=0, keepdims=True)
    ssq = jnp.sum(acc * acc, axis=0, keepdims=True)
    stats_ref[...] = jnp.concatenate([ssum, ssq], axis=0).reshape(
        1, 1, 2, cout_pad)


def _bn_relu_kernel(y_ref, scale_ref, offset_ref, o_ref):
    """y*scale + offset, then ReLU.  All operands are lane-dense (Cout_pad)."""
    y = y_ref[...]
    o_ref[...] = jnp.maximum(
        y * scale_ref[...] + offset_ref[...], 0.0).astype(o_ref.dtype)


def aspp_forward(x_nchw, weight_oihw, gamma, beta, rate):
    """ASPP_module forward. x_nchw: (N, Cin, H, W) -> (N, Cout, H, W)."""
    cout, cin, kh_, _ = weight_oihw.shape
    ksize = kh_
    pad = 0 if ksize == 1 else rate

    n, _, h, w = x_nchw.shape
    cout_pad = _round_up(cout, LANES)
    th = _row_tile(h)
    n_th = h // th

    # NCHW -> NHWC (channels on the lane dimension).
    x = jnp.transpose(x_nchw, (0, 2, 3, 1))
    # TODO(synk): fold the spatial zero-pad (and row-halo tiling for very large
    # images) into the kernel to avoid one extra HBM round trip of the input.
    xp = jnp.pad(x, ((0, 0), (pad, pad), (pad, pad), (0, 0)))
    hp, wp = h + 2 * pad, w + 2 * pad

    # (Cout, Cin, KH, KW) -> (KH*KW*Cin, Cout) padded to a lane-dense Cout.
    w_mat = jnp.transpose(weight_oihw, (2, 3, 1, 0)).reshape(
        ksize * ksize * cin, cout)
    w_mat = jnp.pad(w_mat, ((0, 0), (0, cout_pad - cout))).astype(x.dtype)

    kern1 = functools.partial(
        _conv_stats_kernel, ksize=ksize, rate=rate, th=th, w_out=w,
        cin=cin, cout_pad=cout_pad)

    flops1 = 2 * n * h * w * (ksize * ksize * cin) * cout_pad
    bytes1 = (xp.size * xp.dtype.itemsize + w_mat.size * w_mat.dtype.itemsize
              + n * h * w * cout_pad * 4 + n * n_th * 2 * cout_pad * 4)

    conv_out, stats = pl.pallas_call(
        kern1,
        out_shape=(
            jax.ShapeDtypeStruct((n, h, w, cout_pad), jnp.float32),
            jax.ShapeDtypeStruct((n, n_th, 2, cout_pad), jnp.float32),
        ),
        grid=(n, n_th),
        in_specs=[
            # Whole padded image of one batch element; constant in the
            # row-tile axis -> fetched once per image, revisited from VMEM.
            pl.BlockSpec((1, hp, wp, cin), lambda b, t: (b, 0, 0, 0)),
            pl.BlockSpec((ksize * ksize * cin, cout_pad), lambda b, t: (0, 0)),
        ],
        out_specs=(
            pl.BlockSpec((1, th, w, cout_pad), lambda b, t: (b, t, 0, 0)),
            pl.BlockSpec((1, 1, 2, cout_pad), lambda b, t: (b, t, 0, 0)),
        ),
        compiler_params=pltpu.CompilerParams(
            dimension_semantics=("parallel", "parallel"),
            vmem_limit_bytes=VMEM_LIMIT),
        cost_estimate=pl.CostEstimate(
            flops=flops1, transcendentals=0, bytes_accessed=bytes1),
    )(xp, w_mat)

    # Finish BN stats (tiny per-channel math) and fold gamma/beta/mean/var into
    # a single scale/offset so the second pass is one FMA + max per element.
    count = n * h * w
    tot = jnp.sum(stats, axis=(0, 1))                      # (2, cout_pad)
    mean = tot[0] / count
    var = jnp.maximum(tot[1] / count - mean * mean, 0.0)   # biased (training)
    gamma_p = jnp.pad(gamma.astype(jnp.float32), (0, cout_pad - cout))
    beta_p = jnp.pad(beta.astype(jnp.float32), (0, cout_pad - cout))
    scale = (gamma_p * lax.rsqrt(var + BN_EPS)).reshape(1, cout_pad)
    offset = (beta_p - mean * scale[0]).reshape(1, cout_pad)

    flops2 = 3 * n * h * w * cout_pad
    bytes2 = 2 * n * h * w * cout_pad * 4

    out_nhwc = pl.pallas_call(
        _bn_relu_kernel,
        out_shape=jax.ShapeDtypeStruct((n, h, w, cout_pad), x_nchw.dtype),
        grid=(n, n_th),
        in_specs=[
            pl.BlockSpec((1, th, w, cout_pad), lambda b, t: (b, t, 0, 0)),
            pl.BlockSpec((1, cout_pad), lambda b, t: (0, 0)),
            pl.BlockSpec((1, cout_pad), lambda b, t: (0, 0)),
        ],
        out_specs=pl.BlockSpec((1, th, w, cout_pad), lambda b, t: (b, t, 0, 0)),
        compiler_params=pltpu.CompilerParams(
            dimension_semantics=("parallel", "parallel"),
            vmem_limit_bytes=VMEM_LIMIT),
        cost_estimate=pl.CostEstimate(
            flops=flops2, transcendentals=0, bytes_accessed=bytes2),
    )(conv_out, scale, offset)

    # Drop channel padding, back to NCHW.
    return jnp.transpose(out_nhwc[..., :cout], (0, 3, 1, 2))


def _reference(x_nchw, weight_oihw, gamma, beta, rate):
    """Pure-JAX reference (lax conv + batch-stat BN + ReLU) for validation."""
    ksize = weight_oihw.shape[-1]
    pad = 0 if ksize == 1 else rate
    x = jnp.transpose(x_nchw, (0, 2, 3, 1)).astype(jnp.float32)
    w = jnp.transpose(weight_oihw, (2, 3, 1, 0)).astype(jnp.float32)
    y = lax.conv_general_dilated(
        x, w, window_strides=(1, 1), padding=[(pad, pad), (pad, pad)],
        rhs_dilation=(rate, rate),
        dimension_numbers=("NHWC", "HWIO", "NHWC"))
    mean = jnp.mean(y, axis=(0, 1, 2), keepdims=True)
    var = jnp.mean((y - mean) ** 2, axis=(0, 1, 2), keepdims=True)
    y = (y - mean) * lax.rsqrt(var + BN_EPS) * gamma + beta
    y = jnp.maximum(y, 0.0)
    return jnp.transpose(y, (0, 3, 1, 2)).astype(x_nchw.dtype)


if __name__ == "__main__":
    # Small shapes consistent with ASPP_module(inplanes=4, planes=8, rate=2).
    N, CIN, COUT, H, W, RATE = 2, 4, 8, 16, 16, 2
    KSIZE = 1 if RATE == 1 else 3

    key = jax.random.PRNGKey(0)
    kx, kw = jax.random.split(key)

    x = jax.random.normal(kx, (N, CIN, H, W), dtype=jnp.float32)

    # Kaiming-normal init (fan_in mode, gain=sqrt(2)), matching _init_weight.
    fan_in = CIN * KSIZE * KSIZE
    std = (2.0 / fan_in) ** 0.5
    weight = std * jax.random.normal(kw, (COUT, CIN, KSIZE, KSIZE),
                                     dtype=jnp.float32)
    # BatchNorm2d init: weight filled with 1, bias zeroed.
    gamma = jnp.ones((COUT,), jnp.float32)
    beta = jnp.zeros((COUT,), jnp.float32)

    out = aspp_forward(x, weight, gamma, beta, RATE)
    out = jax.block_until_ready(out)

    ref = _reference(x, weight, gamma, beta, RATE)
    assert out.shape == (N, COUT, H, W)
    assert jnp.allclose(out, ref, atol=5e-4, rtol=5e-4), "mismatch vs reference"

    print("KERNEL_OK")
</pallas_src>

<mosaic_0001>
module attributes {stable_mosaic.version = 11 : i64} {
  func.func @_conv_stats_kernel(%arg0: i32, %arg1: i32, %arg2: memref<1x20x20x4xf32, #tpu.memory_space<vmem>>, %arg3: memref<36x128xf32, #tpu.memory_space<vmem>>, %arg4: memref<1x8x16x128xf32, #tpu.memory_space<vmem>>, %arg5: memref<1x1x2x128xf32, #tpu.memory_space<vmem>>) attributes {dimension_semantics = [#tpu.dimension_semantics<parallel>, #tpu.dimension_semantics<parallel>], iteration_bounds = array<i64: 2, 2>, scalar_prefetch = 0 : i64, scratch_operands = 0 : i64, tpu.core_type = #tpu.core_type<tc>, window_params = [{transform_indices = @transform_0, window_bounds = array<i64: 1, 20, 20, 4>}, {pipeline_mode = #tpu.pipeline_mode<synchronous>, transform_indices = @transform_1, window_bounds = array<i64: 36, 128>}, {transform_indices = @transform_2, window_bounds = array<i64: 1, 8, 16, 128>}, {transform_indices = @transform_3, window_bounds = array<i64: 1, 1, 2, 128>}]} {
    %c8_i32 = arith.constant 8 : i32
    %0 = arith.muli %arg1, %c8_i32 : i32
    %1 = tpu.assume_multiple %0, 8 : i32
    %c0_i32 = arith.constant 0 : i32
    %2 = arith.addi %1, %c0_i32 : i32
    %c0 = arith.constant 0 : index
    %3 = arith.index_cast %2 : i32 to index
    %c0_0 = arith.constant 0 : index
    %c0_1 = arith.constant 0 : index
    %4 = vector.load %arg2[%c0, %3, %c0_0, %c0_1] : memref<1x20x20x4xf32, #tpu.memory_space<vmem>>, vector<1x8x16x4xf32>
    %5 = vector.shape_cast %4 : vector<1x8x16x4xf32> to vector<8x16x4xf32>
    %c0_i32_2 = arith.constant 0 : i32
    %6 = arith.addi %1, %c0_i32_2 : i32
    %c0_3 = arith.constant 0 : index
    %7 = arith.index_cast %6 : i32 to index
    %c2 = arith.constant 2 : index
    %c0_4 = arith.constant 0 : index
    %8 = vector.load %arg2[%c0_3, %7, %c2, %c0_4] : memref<1x20x20x4xf32, #tpu.memory_space<vmem>>, vector<1x8x16x4xf32>
    %9 = vector.shape_cast %8 : vector<1x8x16x4xf32> to vector<8x16x4xf32>
    %c0_i32_5 = arith.constant 0 : i32
    %10 = arith.addi %1, %c0_i32_5 : i32
    %c0_6 = arith.constant 0 : index
    %11 = arith.index_cast %10 : i32 to index
    %c4 = arith.constant 4 : index
    %c0_7 = arith.constant 0 : index
    %12 = vector.load %arg2[%c0_6, %11, %c4, %c0_7] : memref<1x20x20x4xf32, #tpu.memory_space<vmem>>, vector<1x8x16x4xf32>
    %13 = vector.shape_cast %12 : vector<1x8x16x4xf32> to vector<8x16x4xf32>
    %c2_i32 = arith.constant 2 : i32
    %14 = arith.addi %1, %c2_i32 : i32
    %c0_8 = arith.constant 0 : index
    %15 = arith.index_cast %14 : i32 to index
    %c0_9 = arith.constant 0 : index
    %c0_10 = arith.constant 0 : index
    %16 = vector.load %arg2[%c0_8, %15, %c0_9, %c0_10] : memref<1x20x20x4xf32, #tpu.memory_space<vmem>>, vector<1x8x16x4xf32>
    %17 = vector.shape_cast %16 : vector<1x8x16x4xf32> to vector<8x16x4xf32>
    %c2_i32_11 = arith.constant 2 : i32
    %18 = arith.addi %1, %c2_i32_11 : i32
    %c0_12 = arith.constant 0 : index
    %19 = arith.index_cast %18 : i32 to index
    %c2_13 = arith.constant 2 : index
    %c0_14 = arith.constant 0 : index
    %20 = vector.load %arg2[%c0_12, %19, %c2_13, %c0_14] : memref<1x20x20x4xf32, #tpu.memory_space<vmem>>, vector<1x8x16x4xf32>
    %21 = vector.shape_cast %20 : vector<1x8x16x4xf32> to vector<8x16x4xf32>
    %c2_i32_15 = arith.constant 2 : i32
    %22 = arith.addi %1, %c2_i32_15 : i32
    %c0_16 = arith.constant 0 : index
    %23 = arith.index_cast %22 : i32 to index
    %c4_17 = arith.constant 4 : index
    %c0_18 = arith.constant 0 : index
    %24 = vector.load %arg2[%c0_16, %23, %c4_17, %c0_18] : memref<1x20x20x4xf32, #tpu.memory_space<vmem>>, vector<1x8x16x4xf32>
    %25 = vector.shape_cast %24 : vector<1x8x16x4xf32> to vector<8x16x4xf32>
    %c4_i32 = arith.constant 4 : i32
    %26 = arith.addi %1, %c4_i32 : i32
    %c0_19 = arith.constant 0 : index
    %27 = arith.index_cast %26 : i32 to index
    %c0_20 = arith.constant 0 : index
    %c0_21 = arith.constant 0 : index
    %28 = vector.load %arg2[%c0_19, %27, %c0_20, %c0_21] : memref<1x20x20x4xf32, #tpu.memory_space<vmem>>, vector<1x8x16x4xf32>
    %29 = vector.shape_cast %28 : vector<1x8x16x4xf32> to vector<8x16x4xf32>
    %c4_i32_22 = arith.constant 4 : i32
    %30 = arith.addi %1, %c4_i32_22 : i32
    %c0_23 = arith.constant 0 : index
    %31 = arith.index_cast %30 : i32 to index
    %c2_24 = arith.constant 2 : index
    %c0_25 = arith.constant 0 : index
    %32 = vector.load %arg2[%c0_23, %31, %c2_24, %c0_25] : memref<1x20x20x4xf32, #tpu.memory_space<vmem>>, vector<1x8x16x4xf32>
    %33 = vector.shape_cast %32 : vector<1x8x16x4xf32> to vector<8x16x4xf32>
    %c4_i32_26 = arith.constant 4 : i32
    %34 = arith.addi %1, %c4_i32_26 : i32
    %c0_27 = arith.constant 0 : index
    %35 = arith.index_cast %34 : i32 to index
    %c4_28 = arith.constant 4 : index
    %c0_29 = arith.constant 0 : index
    %36 = vector.load %arg2[%c0_27, %35, %c4_28, %c0_29] : memref<1x20x20x4xf32, #tpu.memory_space<vmem>>, vector<1x8x16x4xf32>
    %37 = vector.shape_cast %36 : vector<1x8x16x4xf32> to vector<8x16x4xf32>
    %38 = tpu.concatenate %5, %9, %13, %17, %21, %25, %29, %33, %37 in 2 : vector<8x16x4xf32>, vector<8x16x4xf32>, vector<8x16x4xf32>, vector<8x16x4xf32>, vector<8x16x4xf32>, vector<8x16x4xf32>, vector<8x16x4xf32>, vector<8x16x4xf32>, vector<8x16x4xf32> -> vector<8x16x36xf32>
    %39 = vector.shape_cast %38 : vector<8x16x36xf32> to vector<128x36xf32>
    %c0_30 = arith.constant 0 : index
    %c0_31 = arith.constant 0 : index
    %40 = vector.load %arg3[%c0_30, %c0_31] : memref<36x128xf32, #tpu.memory_space<vmem>>, vector<36x128xf32>
    %cst = arith.constant dense<0.000000e+00> : vector<128x128xf32>
    %41 = tpu.matmul %39, %40, %cst {dimension_numbers = #tpu.dot_dimension_numbers<[1], [0], [0], [1], [0, 0, 1, 1], [], []>} : vector<128x36xf32>, vector<36x128xf32>, vector<128x128xf32> -> vector<128x128xf32>
    %42 = vector.shape_cast %41 : vector<128x128xf32> to vector<1x8x16x128xf32>
    %c0_32 = arith.constant 0 : index
    %c0_33 = arith.constant 0 : index
    %c0_34 = arith.constant 0 : index
    %c0_35 = arith.constant 0 : index
    %43 = vector.load %arg4[%c0_32, %c0_33, %c0_34, %c0_35] : memref<1x8x16x128xf32, #tpu.memory_space<vmem>>, vector<1x8x16x128xf32>
    tpu.vector_store %arg4[%c0_32, %c0_33, %c0_34, %c0_35], %42 {strides = array<i32>} : memref<1x8x16x128xf32, #tpu.memory_space<vmem>>, vector<1x8x16x128xf32>,
    %cst_36 = arith.constant dense<0.000000e+00> : vector<128xf32>
    %44 = vector.multi_reduction <add>, %41, %cst_36 [0] : vector<128x128xf32> to vector<128xf32>
    %45 = vector.shape_cast %44 : vector<128xf32> to vector<1x128xf32>
    %46 = arith.mulf %41, %41 : vector<128x128xf32>
    %cst_37 = arith.constant dense<0.000000e+00> : vector<128xf32>
    %47 = vector.multi_reduction <add>, %46, %cst_37 [0] : vector<128x128xf32> to vector<128xf32>
    %48 = vector.shape_cast %47 : vector<128xf32> to vector<1x128xf32>
    %49 = tpu.concatenate %45, %48 in 0 : vector<1x128xf32>, vector<1x128xf32> -> vector<2x128xf32>
    %50 = vector.shape_cast %49 : vector<2x128xf32> to vector<1x1x2x128xf32>
    %c0_38 = arith.constant 0 : index
    %c0_39 = arith.constant 0 : index
    %c0_40 = arith.constant 0 : index
    %c0_41 = arith.constant 0 : index
    %51 = vector.load %arg5[%c0_38, %c0_39, %c0_40, %c0_41] : memref<1x1x2x128xf32, #tpu.memory_space<vmem>>, vector<1x1x2x128xf32>
    tpu.vector_store %arg5[%c0_38, %c0_39, %c0_40, %c0_41], %50 {strides = array<i32>} : memref<1x1x2x128xf32, #tpu.memory_space<vmem>>, vector<1x1x2x128xf32>,
    return
  }
  func.func @transform_0(%arg0: i32, %arg1: i32) -> (i32, i32, i32, i32) {
    %c0_i32 = arith.constant 0 : i32
    %c0_i32_0 = arith.constant 0 : i32
    %c0_i32_1 = arith.constant 0 : i32
    %c0_i32_2 = arith.constant 0 : i32
    return %arg0, %c0_i32, %c0_i32_0, %c0_i32_1 : i32, i32, i32, i32
  }
  func.func @transform_1(%arg0: i32, %arg1: i32) -> (i32, i32) {
    %c0_i32 = arith.constant 0 : i32
    %c0_i32_0 = arith.constant 0 : i32
    %c0_i32_1 = arith.constant 0 : i32
    return %c0_i32, %c0_i32_0 : i32, i32
  }
  func.func @transform_2(%arg0: i32, %arg1: i32) -> (i32, i32, i32, i32) {
    %c0_i32 = arith.constant 0 : i32
    %c0_i32_0 = arith.constant 0 : i32
    %c0_i32_1 = arith.constant 0 : i32
    return %arg0, %arg1, %c0_i32, %c0_i32_0 : i32, i32, i32, i32
  }
  func.func @transform_3(%arg0: i32, %arg1: i32) -> (i32, i32, i32, i32) {
    %c0_i32 = arith.constant 0 : i32
    %c0_i32_0 = arith.constant 0 : i32
    %c0_i32_1 = arith.constant 0 : i32
    return %arg0, %arg1, %c0_i32, %c0_i32_0 : i32, i32, i32, i32
  }
}

</mosaic_0001>

<bundles_post_ra>
// kernel: tpu_custom_call.1
= control target key start
LH: loop header
LB: loop body
LE: loop exit
PB: predicated region body
PF: predicated region fallthrough
CT: control target
= control target key end

     0   :  { %9 = vsyncpa [#allocation3], 0  ;;  %s2682_s0 = inlined_call_operand.vmem [shape: f32[2,20,20,4], index: 0, kind: input, shape index: {}]   ;;  %s2683_s1 = inlined_call_operand.vmem [shape: f32[36,128], index: 1, kind: input, shape index: {}]   ;;  %s2684_s2 = inlined_call_operand.hbm [shape: f32[2,16,16,128], index: 2, kind: output, shape index: {0}]   ;;  %s2685_s3 = inlined_call_operand.hbm [shape: f32[2,2,2,128], index: 3, kind: output, shape index: {1}]  }
   0x1   :  { %11 = vsyncpa [#allocation3 + $0x1], 0 }
   0x2   :  { %12 = vsyncpa [#allocation5], 0 }
   0x3   :  { %14 = vsyncpa [#allocation5 + $0x1], 0  ;;  %s1887_s12 = smov 0   ;;  %s1889_s13 = smov 0  }
   0x4   :  { %s1891_s14 = smov 0   ;;  %s1893_s15 = smov 0  }
   0x5   :  { %s1895_s16 = smov 0   ;;  %s1897_s17 = smov 0  }
   0x6   :  { %s1899_s18 = smov 0   ;;  %s1901_s19 = smov 0  }
   0x7 LB: > { %s1435_s20 = sadd.s32 4294967295, %s1854_s19   ;;  %s1436_s21 = sadd.s32 4294967294, %s1854_s19   ;;  %s1854_s19 = sphi %s1901_s19, %s20_s19   ;;  %s1850_s18 = sphi %s1899_s18, %s2694_s18   ;;  %s1846_s17 = sphi %s1897_s17, %s2693_s17   ;;  %s1842_s16 = sphi %s1895_s16, %s2692_s16   ;;  %s1838_s15 = sphi %s1893_s15, %s2691_s15   ;;  %s1834_s14 = sphi %s1891_s14, %s2690_s14   ;;  %s1830_s13 = sphi %s1889_s13, %s2689_s13   ;;  %s1826_s12 = sphi %s1887_s12, %s2688_s12  }
   0x8   : > { %s29_s22 = sadd.s32 1, %s1846_s17  ;;  %s32_s23 = sadd.s32 1, %s1850_s18 }
   0x9   : > { %p30_p0 = scmp.ge.s32.totalorder %s29_s22, 2  ;;  %p98_p1 = scmp.ne.s32.totalorder %s1834_s14, %s1830_s13 }
   0xa   : > { %p99_p2 = scmp.eq.s32.totalorder %s1435_s20, 3  ;;  %p104_p5 = scmp.ne.s32.totalorder %s1830_s13, %s1826_s12 }
   0xb   : > { %s2696_s22 = smov (%p30_p0, %s29_s22), 0  ;;  %s2698_s23 = smov (!%p30_p0, %s32_s23), %s1850_s18 }
   0xc   : > { %s84_s24 = ssub.s32 %s1846_s17, %s2696_s22  ;;  %p1938_p3 = por %p99_p2, %p98_p1 }
   0xd   : > { %p34_p4 = scmp.ge.s32.totalorder %s2698_s23, 2  ;;  %p105_p6 = scmp.eq.s32.totalorder %s1436_s21, 3 }
   0xe   : > { %p1439_p7 = scmp.ge.s32.totalorder %s1854_s19, 1  ;;  %p162_p9 = scmp.lt.s32.totalorder %s1854_s19, 5 }
   0xf   : > { %s2700_s23 = smov (%p34_p4, %s2698_s23), 0  ;;  %p1947_p8 = por %p105_p6, %p104_p5 }
  0x10   : > { %s83_s27 = ssub.s32 %s1850_s18, %s2700_s23  ;;  %s88_s28 = sadd.s32 1, %s1834_s14 }
  0x11   : > { %s85_s29 = sor.u32 %s84_s24, %s83_s27  ;;  %p163_p10 = pnand %p1439_p7, %p162_p9 }
  0x12   : > { %p86_p11 = scmp.eq.s32.totalorder %s85_s29, 0  ;;  %p191_p12 = scmp.lt.s32.totalorder (!%p163_p10), %s1842_s16, 1  ;;  %v998_v14 = vld [vmem:[%s2683_s1] sm:$0xff] (!%p163_p10)  ;;  %v999_v15 = vld [vmem:[%s2683_s1 + $0x8] sm:$0xff] (!%p163_p10)  ;;  %v1000_v19 = vld [vmem:[%s2683_s1 + $0x10] sm:$0xff] (!%p163_p10)  ;;  %vm1052_vm0 = vcmask (!%p163_p10), 1043456  }
  0x13   : > { %166 = sbr.rel (%p163_p10) target bundleno = 660 (0x294), region = 28  ;;  %s1856_s11 = smov (!%p163_p10), 8   ;;  %v1628_v16 = vpack.c.bf16 (!%p163_p10), %v999_v15, %v998_v14  ;;  %v1001_v20 = vld [vmem:[%s2683_s1 + $0x18] sm:$0xff] (!%p163_p10)  ;;  %v1002_v24 = vld [vmem:[%s2683_s1 + $0x20] sm:$0xf] (!%p163_p10)  ;;  %vm862_vm1 = vcmask (!%p163_p10), 31744  }
  0x14   : > { %s1956_s30 = scalar_select %p86_p11, %s1834_s14, %s88_s28  }
  0x15   : > { %s1444_s5 = smul.u32 (!%p163_p10), 192, %s1838_s15  ;;  %s1857_s20 = smov (!%p163_p10), 4   ;;  %1629 = vmatprep.subr.bf16.mxu0 (!%p163_p10), %v1628_v16  ;;  %1636 = vmatprep.subr.bf16.mxu1 (!%p163_p10), %v1628_v16  ;;  %v1632_v23 = vpack.c.bf16 (!%p163_p10), %v1001_v20, %v1000_v19  ;;  %vm879_vm2 = vcmask (!%p163_p10), 64512   ;;  %vm896_vm3 = vcmask (!%p163_p10), 97280   ;;  %vm913_vm4 = vcmask (!%p163_p10), 130048  }
  0x16   : > { %s1858_s21 = smov (!%p163_p10), 12   ;;  %s1859_s24 = smov (!%p163_p10), 16   ;;  %1631 = vmatpush3.bf16.msra.mxu0 (!%p163_p10), %v1628_v16  ;;  %1639 = vmatpush3.bf16.msra.mxu1 (!%p163_p10), %v1628_v16  ;;  %vm930_vm5 = vcmask (!%p163_p10), 162816   ;;  %vm947_vm6 = vcmask (!%p163_p10), 195584   ;;  %vm964_vm7 = vcmask (!%p163_p10), 228352   ;;  %vm981_vm8 = vcmask (!%p163_p10), 261120  }
  0x17   : > { %s1860_s27 = smov (!%p163_p10), 20   ;;  %1633 = vmatprep.subr.bf16.mxu0 (!%p163_p10), %v1632_v23  ;;  %1637 = vmatprep.subr.bf16.mxu1 (!%p163_p10), %v1632_v23  ;;  %s1862_s29 = smov (!%p163_p10), 28   ;;  %vm1003_vm9 = vcmask (!%p163_p10), 293888  }
  0x18   : > { %s1863_s7 = smov (!%p163_p10), 32  }
  0x1a   : > { %s192_s4 = scalar_select %p191_p12, %s1842_s16, 1  ;;  %1635 = vmatpush3.bf16.msra.mxu0 %v1632_v23  ;;  %1640 = vmatpush3.bf16.msra.mxu1 %v1632_v23 }
  0x1b   : > { %1602 = vmatprep.subr.msk.mxu0 %vm1052_vm0, %v1002_v24  ;;  %1638 = vmatprep.subr.msk.mxu1 %vm1052_vm0, %v1002_v24 }
  0x1c   : > { %s1642_s6 = smul.u32 480, %s192_s4 }
  0x1e   : > { %s195_s9 = scalar_lea.vmem %s2682_s0, %s1642_s6  ;;  %s1861_s6 = smov 24   ;;  %1603 = vmatpush3.msk.msra.mxu0 %vm1052_vm0, %v1002_v24  ;;  %1641 = vmatpush3.msk.msra.mxu1 %vm1052_vm0, %v1002_v24 }
  0x1f   : > { %s1964_s10 = scalar_lea.vmem %s195_s9, %s1444_s5 }
  0x20   : > { %v232_v0 = vld [vmem:[%s1964_s10 + $0x4] sm:$0xff]  ;;  %v233_v2 = vld [vmem:[%s1964_s10 + $0xc] sm:$0xff]  ;;  %v1975_v4 = vld [vmem:[%s1964_s10 + $0x38] sm:$0xff] }
  0x21   : > { %v216_v1 = vld [vmem:[%s1964_s10 + $0x2] sm:$0xff]  ;;  %430 = vrot.lane.b32.xlu1 %v232_v0, %s1856_s11  ;;  %v217_v3 = vld [vmem:[%s1964_s10 + $0xa] sm:$0xff]  ;;  %v218_v6 = vld [vmem:[%s1964_s10 + $0x1a] sm:$0xff] }
  0x22   : > { %366 = vrot.lane.b32.xlu0 %v216_v1, %s1857_s20  ;;  %v1978_v5 = vld [vmem:[%s1964_s10 + $0x30] sm:$0xff]  ;;  %v1464_v9 = vld [vmem:[%s1964_s10 + $0x3a] sm:$0xff]  ;;  %v219_v11 = vld [vmem:[%s1964_s10 + $0x22] sm:$0xff] }
  0x23   : > { %v1463_v7 = vld [vmem:[%s1964_s10 + $0x32] sm:$0xff]  ;;  %v234_v10 = vld [vmem:[%s1964_s10 + $0x1c] sm:$0xff]  ;;  %v2010_v17 = vld [vmem:[%s1964_s10 + $0x48] sm:$0xff] }
  0x24   : > { %v1479_v8 = vld [vmem:[%s1964_s10 + $0x34] sm:$0xff]  ;;  %v1997_v12 = vld [vmem:[%s1964_s10 + $0x60] sm:$0xff]  ;;  %v2026_v22 = vld [vmem:[%s1964_s10 + $0x68] sm:$0xff] }
  0x25   : > { %432 = vrot.lane.b32.xlu1 %v233_v2, %s1856_s11  ;;  %v1480_v13 = vld [vmem:[%s1964_s10 + $0x3c] sm:$0xff]  ;;  %v235_v18 = vld [vmem:[%s1964_s10 + $0x24] sm:$0xff]  ;;  %v2037_v26 = vld [vmem:[%s1964_s10 + $0x50] sm:$0xff] }
  0x26   : > { %368 = vrot.lane.b32.xlu0 %v217_v3, %s1857_s20  ;;  %v2023_v21 = vld [vmem:[%s1964_s10 + $0x62] sm:$0xff]  ;;  %v1465_v25 = vld [vmem:[%s1964_s10 + $0x4a] sm:$0xff]  ;;  %v1466_v29 = vld [vmem:[%s1964_s10 + $0x52] sm:$0xff] }
  0x27   : > { %v1529_v27 = vld [vmem:[%s1964_s10 + $0x64] sm:$0xff]  ;;  %v1530_v30 = vld [vmem:[%s1964_s10 + $0x6c] sm:$0xff]  ;;  %v2056_v32 = vld [vmem:[%s1964_s10 + $0x78] sm:$0xff] }
  0x28   : > { %v1514_v28 = vld [vmem:[%s1964_s10 + $0x6a] sm:$0xff]  ;;  %v1482_v33 = vld [vmem:[%s1964_s10 + $0x54] sm:$0xff]  ;;  %v2069_v35 = vld [vmem:[%s1964_s10 + $0x80] sm:$0xff] }
  0x29   : > { %496 = vrot.lane.b32.xlu1 %v1975_v4, %s1858_s21  ;;  %v1481_v31 = vld [vmem:[%s1964_s10 + $0x4c] sm:$0xff]  ;;  %v2066_v34 = vld [vmem:[%s1964_s10 + $0x7a] sm:$0xff]  ;;  %v2083_v37 = vld [vmem:[%s1964_s10 + $0x82] sm:$0xff] }
  0x2a   : > { %494 = vrot.lane.b32.xlu0 %v1978_v5, %s1858_s21  ;;  %v2080_v36 = vld [vmem:[%s1964_s10 + $0x7c] sm:$0xff]  ;;  %v2092_v38 = vld [vmem:[%s1964_s10 + $0x84] sm:$0xff]  ;;  %v2100_v39 = vld [vmem:[%s1964_s10 + $0x90] sm:$0xff] }
  0x2b   : > { %v2109_v40 = vld [vmem:[%s1964_s10 + $0x92] sm:$0xff]  ;;  %v2126_v43 = vld [vmem:[%s1964_s10 + $0x9a] sm:$0xff]  ;;  %v2146_v47 = vld [vmem:[%s1964_s10 + $0xa8] sm:$0xff] }
  0x2c   : > { %v2112_v41 = vld [vmem:[%s1964_s10 + $0x98] sm:$0xff]  ;;  %v2160_v52 = vld [vmem:[%s1964_s10 + $0xaa] sm:$0xff]  ;;  %v200_v3 = vld [vmem:[%s1964_s10] sm:$0xff] }
  0x2d   : > { %370 = vrot.lane.b32.xlu1 %v218_v6, %s1857_s20  ;;  %v2123_v42 = vld [vmem:[%s1964_s10 + $0x94] sm:$0xff]  ;;  %v2137_v44 = vld [vmem:[%s1964_s10 + $0x9c] sm:$0xff]  ;;  %v2176_v58 = vld [vmem:[%s1964_s10 + $0xac] sm:$0xff] }
  0x2e   : > { %558 = vrot.lane.b32.xlu0 %v1463_v7, %s1859_s24  ;;  %v2163_v53 = vld [vmem:[%s1964_s10 + $0xb0] sm:$0xff]  ;;  %v201_v15 = vld [vmem:[%s1964_s10 + $0x8] sm:$0xff] }
  0x2f   : > { %v2179_v59 = vld [vmem:[%s1964_s10 + $0xb2] sm:$0xff] }
  0x30   : > { %v2194_v0 = vld [vmem:[%s1964_s10 + $0xb4] sm:$0xff] }
  0x31   : > { %622 = vrot.lane.b32.xlu1 %v1479_v8, %s1860_s27 }
  0x32   : > { %560 = vrot.lane.b32.xlu0 %v1464_v9, %s1859_s24 }
  0x35   : > { %434 = vrot.lane.b32.xlu1 %v234_v10, %s1856_s11  ;;  %v2212_v10 = vld [vmem:[%s1964_s10 + $0xc0] sm:$0xff] }
  0x36   : > { %372 = vrot.lane.b32.xlu0 %v219_v11, %s1857_s20 }
  0x39   : > { %686 = vrot.lane.b32.xlu1 %v1997_v12, %s1861_s6 }
  0x3a   : > { %624 = vrot.lane.b32.xlu0 %v1480_v13, %s1860_s27 }
  0x3d   : > { %498 = vrot.lane.b32.xlu1 %v2010_v17, %s1858_s21 }
  0x3e   : > { %436 = vrot.lane.b32.xlu0 %v235_v18, %s1856_s11 }
  0x41   : > { %750 = vrot.lane.b32.xlu1 %v2023_v21, %s1862_s29 }
  0x42   : > { %688 = vrot.lane.b32.xlu0 %v2026_v22, %s1861_s6 }
  0x45   : > { %562 = vrot.lane.b32.xlu1 %v1465_v25, %s1859_s24 }
  0x46   : > { %500 = vrot.lane.b32.xlu0 %v2037_v26, %s1858_s21 }
  0x49   : > { %814 = vrot.lane.b32.xlu1 %v1529_v27, %s1863_s7 }
  0x4a   : > { %752 = vrot.lane.b32.xlu0 %v1514_v28, %s1862_s29 }
  0x4d   : > { %564 = vrot.lane.b32.xlu1 %v1466_v29, %s1859_s24 }
  0x4e   : > { %374 = vrot.lane.b32.xlu0 %v1463_v7, %s1857_s20 }
  0x51   : > { %816 = vrot.lane.b32.xlu1 %v1530_v30, %s1863_s7 }
  0x52   : > { %626 = vrot.lane.b32.xlu0 %v1481_v31, %s1860_s27 }
  0x55   : > { %438 = vrot.lane.b32.xlu1 %v1479_v8, %s1856_s11 }
  0x56   : > { %376 = vrot.lane.b32.xlu0 %v1464_v9, %s1857_s20 }
  0x59   : > { %690 = vrot.lane.b32.xlu1 %v2056_v32, %s1861_s6 }
  0x5a   : > { %628 = vrot.lane.b32.xlu0 %v1482_v33, %s1860_s27 }
  0x5d   : > { %502 = vrot.lane.b32.xlu1 %v1997_v12, %s1858_s21 }
  0x5e   : > { %440 = vrot.lane.b32.xlu0 %v1480_v13, %s1856_s11 }
  0x61   : > { %754 = vrot.lane.b32.xlu1 %v2066_v34, %s1862_s29 }
  0x62   : > { %692 = vrot.lane.b32.xlu0 %v2069_v35, %s1861_s6 }
  0x65   : > { %566 = vrot.lane.b32.xlu1 %v2023_v21, %s1859_s24 }
  0x66   : > { %504 = vrot.lane.b32.xlu0 %v2026_v22, %s1858_s21 }
  0x69   : > { %818 = vrot.lane.b32.xlu1 %v2080_v36, %s1863_s7 }
  0x6a   : > { %756 = vrot.lane.b32.xlu0 %v2083_v37, %s1862_s29 }
  0x6d   : > { %568 = vrot.lane.b32.xlu1 %v1514_v28, %s1859_s24 }
  0x6e   : > { %378 = vrot.lane.b32.xlu0 %v1465_v25, %s1857_s20 }
  0x71   : > { %820 = vrot.lane.b32.xlu1 %v2092_v38, %s1863_s7 }
  0x72   : > { %630 = vrot.lane.b32.xlu0 %v1529_v27, %s1860_s27 }
  0x75   : > { %442 = vrot.lane.b32.xlu1 %v1481_v31, %s1856_s11 }
  0x76   : > { %380 = vrot.lane.b32.xlu0 %v1466_v29, %s1857_s20  ;;  %v2241_v29 = vld [vmem:[%s1964_s10 + $0xc8] sm:$0xff] }
  0x79   : > { %694 = vrot.lane.b32.xlu1 %v2100_v39, %s1861_s6 }
  0x7a   : > { %632 = vrot.lane.b32.xlu0 %v1530_v30, %s1860_s27 }
  0x7d   : > { %506 = vrot.lane.b32.xlu1 %v2056_v32, %s1858_s21 }
  0x7e   : > { %444 = vrot.lane.b32.xlu0 %v1482_v33, %s1856_s11 }
  0x81   : > { %758 = vrot.lane.b32.xlu1 %v2109_v40, %s1862_s29 }
  0x82   : > { %696 = vrot.lane.b32.xlu0 %v2112_v41, %s1861_s6 }
  0x85   : > { %570 = vrot.lane.b32.xlu1 %v2066_v34, %s1859_s24 }
  0x86   : > { %508 = vrot.lane.b32.xlu0 %v2069_v35, %s1858_s21 }
  0x89   : > { %822 = vrot.lane.b32.xlu1 %v2123_v42, %s1863_s7 }
  0x8a   : > { %760 = vrot.lane.b32.xlu0 %v2126_v43, %s1862_s29 }
  0x8d   : > { %572 = vrot.lane.b32.xlu1 %v2083_v37, %s1859_s24 }
  0x8e   : > { %382 = vrot.lane.b32.xlu0 %v2023_v21, %s1857_s20 }
  0x91   : > { %824 = vrot.lane.b32.xlu1 %v2137_v44, %s1863_s7 }
  0x92   : > { %634 = vrot.lane.b32.xlu0 %v2080_v36, %s1860_s27 }
  0x93   : > { %v431_v45 = vpop.permute.xlu1 %430 }
  0x94   : > { %v367_v46 = vpop.permute.xlu0 %366 }
  0x95   : > { %446 = vrot.lane.b32.xlu1 %v1529_v27, %s1856_s11  ;;  %v863_v6 = vsel %vm862_vm1, %v200_v3, %v367_v46 }
  0x96   : > { %384 = vrot.lane.b32.xlu0 %v1514_v28, %s1857_s20  ;;  %v880_v9 = vsel %vm879_vm2, %v863_v6, %v431_v45  ;;  %v2238_v28 = vld [vmem:[%s1964_s10 + $0xc2] sm:$0xff]  ;;  %v202_v6 = vld [vmem:[%s1964_s10 + $0x18] sm:$0xff] }
  0x97   : > { %v2148_v48 = vpop.permute.xlu1 %432 }
  0x98   : > { %v369_v49 = vpop.permute.xlu0 %368 }
  0x99   : > { %698 = vrot.lane.b32.xlu1 %v2146_v47, %s1861_s6  ;;  %v864_v20 = vsel %vm862_vm1, %v201_v15, %v369_v49  ;;  %v2262_v49 = vld [vmem:[%s1964_s10 + $0xc4] sm:$0xff] }
  0x9a   : > { %636 = vrot.lane.b32.xlu0 %v2092_v38, %s1860_s27  ;;  %v881_v27 = vsel %vm879_vm2, %v864_v20, %v2148_v48 }
  0x9b   : > { %v2154_v50 = vpop.permute.xlu1 %496 }
  0x9c   : > { %v495_v51 = vpop.permute.xlu0 %494 }
  0x9d   : > { %510 = vrot.lane.b32.xlu1 %v2100_v39, %s1858_s21  ;;  %v897_v11 = vsel %vm896_vm3, %v880_v9, %v495_v51 }
  0x9e   : > { %448 = vrot.lane.b32.xlu0 %v1530_v30, %s1856_s11  ;;  %v898_v30 = vsel %vm896_vm3, %v881_v27, %v2154_v50  ;;  %v2265_v50 = vld [vmem:[%s1964_s10 + $0xca] sm:$0xff] }
  0x9f   : > { %v2165_v54 = vpop.permute.xlu1 %370 }
  0xa0   : > { %v559_v55 = vpop.permute.xlu0 %558  ;;  %v865_v9 = vsel %vm862_vm1, %v202_v6, %v2165_v54 }
  0xa1   : > { %762 = vrot.lane.b32.xlu1 %v2160_v52, %s1862_s29  ;;  %v914_v16 = vsel %vm913_vm4, %v897_v11, %v559_v55  ;;  %v2300_v11 = vld [vmem:[%s1964_s10 + $0xd8] sm:$0xff] }
  0xa2   : > { %700 = vrot.lane.b32.xlu0 %v2163_v53, %s1861_s6 }
  0xa3   : > { %v623_v56 = vpop.permute.xlu1 %622 }
  0xa4   : > { %v561_v57 = vpop.permute.xlu0 %560  ;;  %v931_v18 = vsel %vm930_vm5, %v914_v16, %v623_v56 }
  0xa5   : > { %574 = vrot.lane.b32.xlu1 %v2109_v40, %s1859_s24 }
  0xa6   : > { %512 = vrot.lane.b32.xlu0 %v2112_v41, %s1858_s21 }
  0xa7   : > { %v2181_v60 = vpop.permute.xlu1 %434 }
  0xa8   : > { %v2183_v61 = vpop.permute.xlu0 %372 }
  0xa9   : > { %826 = vrot.lane.b32.xlu1 %v2176_v58, %s1863_s7 }
  0xaa   : > { %764 = vrot.lane.b32.xlu0 %v2179_v59, %s1862_s29 }
  0xab   : > { %v687_v62 = vpop.permute.xlu1 %686 }
  0xac   : > { %v625_v63 = vpop.permute.xlu0 %624  ;;  %v948_v19 = vsel %vm947_vm6, %v931_v18, %v687_v62  ;;  %v2280_v62 = vld [vmem:[%s1964_s10 + $0xcc] sm:$0xff] }
  0xad   : > { %576 = vrot.lane.b32.xlu1 %v2126_v43, %s1859_s24 }
  0xae   : > { %386 = vrot.lane.b32.xlu0 %v2066_v34, %s1857_s20  ;;  %v915_v34 = vsel %vm913_vm4, %v898_v30, %v561_v57 }
  0xaf   : > { %v2196_v1 = vpop.permute.xlu1 %498 }
  0xb0   : > { %v2198_v2 = vpop.permute.xlu0 %436 }
  0xb1   : > { %828 = vrot.lane.b32.xlu1 %v2194_v0, %s1863_s7 }
  0xb2   : > { %638 = vrot.lane.b32.xlu0 %v2123_v42, %s1860_s27 }
  0xb3   : > { %v751_v7 = vpop.permute.xlu1 %750 }
  0xb4   : > { %v689_v8 = vpop.permute.xlu0 %688  ;;  %v965_v21 = vsel %vm964_vm7, %v948_v19, %v751_v7 }
  0xb5   : > { %450 = vrot.lane.b32.xlu1 %v2080_v36, %s1856_s11  ;;  %v932_v36 = vsel %vm930_vm5, %v915_v34, %v625_v63 }
  0xb6   : > { %388 = vrot.lane.b32.xlu0 %v2083_v37, %s1857_s20  ;;  %v949_v37 = vsel %vm947_vm6, %v932_v36, %v689_v8 }
  0xb7   : > { %v2215_v13 = vpop.permute.xlu1 %562 }
  0xb8   : > { %v2217_v14 = vpop.permute.xlu0 %500 }
  0xb9   : > { %702 = vrot.lane.b32.xlu1 %v2212_v10, %s1861_s6 }
  0xba   : > { %640 = vrot.lane.b32.xlu0 %v2137_v44, %s1860_s27 }
  0xbb   : > { %v815_v23 = vpop.permute.xlu1 %814 }
  0xbc   : > { %v753_v24 = vpop.permute.xlu0 %752  ;;  %v982_v25 = vsel %vm981_vm8, %v965_v21, %v815_v23 }
  0xbd   : > { %514 = vrot.lane.b32.xlu1 %v2146_v47, %s1858_s21  ;;  %1604 = vmatprep.mubr.msk.f32.mxu0 %vm1003_vm9, %v982_v25  ;;  %v2330_v25 = vld [vmem:[%s1964_s10 + $0xe0] sm:$0xff] }
  0xbe   : > { %452 = vrot.lane.b32.xlu0 %v2092_v38, %s1856_s11  ;;  %v966_v38 = vsel %vm964_vm7, %v949_v37, %v753_v24  ;;  %v2327_v24 = vld [vmem:[%s1964_s10 + $0xda] sm:$0xff] }
  0xbf   : > { %v565_v31 = vpop.permute.xlu1 %564 }
  0xc0   : > { %v2245_v33 = vpop.permute.xlu0 %374 }
  0xc1   : > { %766 = vrot.lane.b32.xlu1 %v2238_v28, %s1862_s29 }
  0xc2   : > { %704 = vrot.lane.b32.xlu0 %v2241_v29, %s1861_s6 }
  0xc3   : > { %v817_v45 = vpop.permute.xlu1 %816 }
  0xc4   : > { %v627_v46 = vpop.permute.xlu0 %626  ;;  %v983_v48 = vsel %vm981_vm8, %v966_v38, %v817_v45  ;;  %v2354_v38 = vld [vmem:[%s1964_s10 + $0xe2] sm:$0xff] }
  0xc5   : > { %578 = vrot.lane.b32.xlu1 %v2160_v52, %s1859_s24  ;;  %1605 = vmatmul.mubr.msk.f32.vlgmr.msra.gmra.mrb[0].mxu0 %vm1003_vm9, %v983_v48 }
  0xc6   : > { %516 = vrot.lane.b32.xlu0 %v2163_v53, %s1858_s21 }
  0xc7   : > { %v2267_v51 = vpop.permute.xlu1 %438 }
  0xc8   : > { %v2269_v55 = vpop.permute.xlu0 %376 }
  0xc9   : > { %830 = vrot.lane.b32.xlu1 %v2262_v49, %s1863_s7 }
  0xca   : > { %768 = vrot.lane.b32.xlu0 %v2265_v50, %s1862_s29 }
  0xcb   : > { %v691_v56 = vpop.permute.xlu1 %690 }
  0xcc   : > { %v629_v57 = vpop.permute.xlu0 %628 }
  0xcd   : > { %580 = vrot.lane.b32.xlu1 %v2179_v59, %s1859_s24 }
  0xce   : > { %390 = vrot.lane.b32.xlu0 %v2109_v40, %s1857_s20  ;;  %v882_v40 = vsel %vm879_vm2, %v865_v9, %v2181_v60 }
  0xcf   : > { %v2282_v63 = vpop.permute.xlu1 %502  ;;  %v899_v15 = vsel %vm896_vm3, %v882_v40, %v2196_v1 }
  0xd0   : > { %v2284_v3 = vpop.permute.xlu0 %440  ;;  %v916_v54 = vsel %vm913_vm4, %v899_v15, %v2215_v13 }
  0xd1   : > { %832 = vrot.lane.b32.xlu1 %v2280_v62, %s1863_s7 }
  0xd2   : > { %642 = vrot.lane.b32.xlu0 %v2176_v58, %s1860_s27 }
  0xd3   : > { %v755_v7 = vpop.permute.xlu1 %754 }
  0xd4   : > { %v693_v8 = vpop.permute.xlu0 %692 }
  0xd5   : > { %454 = vrot.lane.b32.xlu1 %v2123_v42, %s1856_s11  ;;  %v933_v42 = vsel %vm930_vm5, %v916_v54, %v627_v46  ;;  %v868_v54 = vsel %vm862_vm1, %v1975_v4, %v2269_v55 }
  0xd6   : > { %392 = vrot.lane.b32.xlu0 %v2126_v43, %s1857_s20  ;;  %v203_v43 = vld [vmem:[%s1964_s10 + $0x20] sm:$0xff]  ;;  %v950_v60 = vsel %vm947_vm6, %v933_v42, %v691_v56  ;;  %v1510_v42 = vld [vmem:[%s1964_s10 + $0xf8] sm:$0xff] }
  0xd7   : > { %v567_v16 = vpop.permute.xlu1 %566  ;;  %v967_v1 = vsel %vm964_vm7, %v950_v60, %v755_v7  ;;  %v866_v13 = vsel %vm862_vm1, %v203_v43, %v2183_v61 }
  0xd8   : > { %v2304_v18 = vpop.permute.xlu0 %504  ;;  %v883_v23 = vsel %vm879_vm2, %v866_v13, %v2198_v2 }
  0xd9   : > { %706 = vrot.lane.b32.xlu1 %v2300_v11, %s1861_s6  ;;  %v900_v27 = vsel %vm896_vm3, %v883_v23, %v2217_v14 }
  0xda   : > { %644 = vrot.lane.b32.xlu0 %v2194_v0, %s1860_s27 }
  0xdb   : > { %v819_v19 = vpop.permute.xlu1 %818 }
  0xdc   : > { %v757_v20 = vpop.permute.xlu0 %756  ;;  %v984_v21 = vsel %vm981_vm8, %v967_v1, %v819_v19 }
  0xdd   : > { %518 = vrot.lane.b32.xlu1 %v2212_v10, %s1858_s21  ;;  %1607 = vmatprep.mubr.msk.f32.mxu0 %vm1003_vm9, %v984_v21  ;;  %v917_v10 = vsel %vm913_vm4, %v900_v27, %v565_v31  ;;  %v2351_v31 = vld [vmem:[%s1964_s10 + $0xdc] sm:$0xff] }
  0xde   : > { %456 = vrot.lane.b32.xlu0 %v2137_v44, %s1856_s11  ;;  %v934_v44 = vsel %vm930_vm5, %v917_v10, %v629_v57  ;;  %v1526_v21 = vld [vmem:[%s1964_s10 + $0xfa] sm:$0xff] }
  0xdf   : > { %v569_v61 = vpop.permute.xlu1 %568  ;;  %v951_v2 = vsel %vm947_vm6, %v934_v44, %v693_v8  ;;  %v867_v8 = vsel %vm862_vm1, %v1978_v5, %v2245_v33  ;;  %v1512_v44 = vld [vmem:[%s1964_s10 + $0x110] sm:$0xff] }
  0xe0   : > { %v2334_v30 = vpop.permute.xlu0 %378  ;;  %v968_v34 = vsel %vm964_vm7, %v951_v2, %v757_v20  ;;  %v1541_v20 = vld [vmem:[%s1964_s10 + $0xf4] sm:$0xff]  ;;  %v1511_v2 = vld [vmem:[%s1964_s10 + $0x108] sm:$0xff] }
  0xe1   : > { %770 = vrot.lane.b32.xlu1 %v2327_v24, %s1862_s29 }
  0xe2   : > { %708 = vrot.lane.b32.xlu0 %v2330_v25, %s1861_s6 }
  0xe3   : > { %v821_v36 = vpop.permute.xlu1 %820 }
  0xe4   : > { %v631_v14 = vpop.permute.xlu0 %630  ;;  %v985_v37 = vsel %vm981_vm8, %v968_v34, %v821_v36 }
  0xe5   : > { %582 = vrot.lane.b32.xlu1 %v2238_v28, %s1859_s24  ;;  %1608 = vmatmul.mubr.msk.f32.gmra.mrb[2].mxu0 %vm1003_vm9, %v985_v37 }
  0xe6   : > { %520 = vrot.lane.b32.xlu0 %v2241_v29, %s1858_s21  ;;  %v1540_v29 = vld [vmem:[%s1964_s10 + $0xe4] sm:$0xff] }
  0xe7   : > { %v2356_v45 = vpop.permute.xlu1 %442 }
  0xe8   : > { %v2358_v46 = vpop.permute.xlu0 %380 }
  0xe9   : > { %834 = vrot.lane.b32.xlu1 %v2351_v31, %s1863_s7 }
  0xea   : > { %772 = vrot.lane.b32.xlu0 %v2354_v38, %s1862_s29 }
  0xeb   : > { %v695_v28 = vpop.permute.xlu1 %694 }
  0xec   : > { %v633_v48 = vpop.permute.xlu0 %632 }
  0xed   : > { %584 = vrot.lane.b32.xlu1 %v2265_v50, %s1859_s24  ;;  %v1509_v50 = vld [vmem:[%s1964_s10 + $0xf0] sm:$0xff] }
  0xee   : > { %394 = vrot.lane.b32.xlu0 %v2160_v52, %s1857_s20  ;;  %v884_v52 = vsel %vm879_vm2, %v867_v8, %v2267_v51  ;;  %v1543_v8 = vld [vmem:[%s1964_s10 + $0x10c] sm:$0xff] }
  0xef   : > { %v2369_v56 = vpop.permute.xlu1 %506  ;;  %v901_v9 = vsel %vm896_vm3, %v884_v52, %v2282_v63 }
  0xf0   : > { %v2371_v57 = vpop.permute.xlu0 %444  ;;  %v918_v5 = vsel %vm913_vm4, %v901_v9, %v567_v16  ;;  %v1525_v16 = vld [vmem:[%s1964_s10 + $0xf2] sm:$0xff]  ;;  %v870_v9 = vsel %vm862_vm1, %v2037_v26, %v2358_v46 }
  0xf1   : > { %836 = vrot.lane.b32.xlu1 %v1540_v29, %s1863_s7  ;;  %v935_v33 = vsel %vm930_vm5, %v918_v5, %v631_v14  ;;  %v869_v14 = vsel %vm862_vm1, %v2010_v17, %v2334_v30  ;;  %v1544_v30 = vld [vmem:[%s1964_s10 + $0x114] sm:$0xff] }
  0xf2   : > { %646 = vrot.lane.b32.xlu0 %v2262_v49, %s1860_s27  ;;  %v886_v37 = vsel %vm879_vm2, %v869_v14, %v2356_v45 }
  0xf3   : > { %v759_v6 = vpop.permute.xlu1 %758 }
  0xf4   : > { %v697_v7 = vpop.permute.xlu0 %696 }
  0xf5   : > { %458 = vrot.lane.b32.xlu1 %v2176_v58, %s1856_s11  ;;  %v952_v58 = vsel %vm947_vm6, %v935_v33, %v695_v28  ;;  %v903_v28 = vsel %vm896_vm3, %v886_v37, %v2369_v56 }
  0xf6   : > { %396 = vrot.lane.b32.xlu0 %v2179_v59, %s1857_s20  ;;  %v969_v59 = vsel %vm964_vm7, %v952_v58, %v759_v6 }
  0xf7   : > { %v571_v49 = vpop.permute.xlu1 %570 }
  0xf8   : > { %v2388_v40 = vpop.permute.xlu0 %508  ;;  %v920_v6 = vsel %vm913_vm4, %v903_v28, %v571_v49  ;;  %v887_v49 = vsel %vm879_vm2, %v870_v9, %v2371_v57 }
  0xf9   : > { %710 = vrot.lane.b32.xlu1 %v1509_v50, %s1861_s6  ;;  %v904_v5 = vsel %vm896_vm3, %v887_v49, %v2388_v40 }
  0xfa   : > { %648 = vrot.lane.b32.xlu0 %v2280_v62, %s1860_s27  ;;  %v885_v62 = vsel %vm879_vm2, %v868_v54, %v2284_v3 }
  0xfb   : > { %v823_v51 = vpop.permute.xlu1 %822  ;;  %v902_v43 = vsel %vm896_vm3, %v885_v62, %v2304_v18 }
  0xfc   : > { %v761_v63 = vpop.permute.xlu0 %760  ;;  %v986_v15 = vsel %vm981_vm8, %v969_v59, %v823_v51  ;;  %v919_v55 = vsel %vm913_vm4, %v902_v43, %v569_v61 }
  0xfd   : > { %522 = vrot.lane.b32.xlu1 %v2300_v11, %s1858_s21  ;;  %1610 = vmatprep.mubr.msk.f32.mxu0 %vm1003_vm9, %v986_v15  ;;  %v936_v11 = vsel %vm930_vm5, %v919_v55, %v633_v48 }
  0xfe   : > { %460 = vrot.lane.b32.xlu0 %v2194_v0, %s1856_s11  ;;  %v953_v0 = vsel %vm947_vm6, %v936_v11, %v697_v7 }
  0xff   : > { %v573_v60 = vpop.permute.xlu1 %572  ;;  %v970_v3 = vsel %vm964_vm7, %v953_v0, %v761_v63 }
 0x100   : > { %v2412_v4 = vpop.permute.xlu0 %382  ;;  %v921_v59 = vsel %vm913_vm4, %v904_v5, %v573_v60 }
 0x101   : > { %774 = vrot.lane.b32.xlu1 %v1525_v16, %s1862_s29  ;;  %v871_v11 = vsel %vm862_vm1, %v1997_v12, %v2412_v4 }
 0x102   : > { %712 = vrot.lane.b32.xlu0 %v1510_v42, %s1861_s6 }
 0x103   : > { %v825_v1 = vpop.permute.xlu1 %824 }
 0x104   : > { %v635_v19 = vpop.permute.xlu0 %634  ;;  %v987_v18 = vsel %vm981_vm8, %v970_v3, %v825_v1 }
 0x105   : > { %586 = vrot.lane.b32.xlu1 %v2327_v24, %s1859_s24  ;;  %1611 = vmatmul.mubr.msk.f32.gmra.mrb[4].mxu0 %vm1003_vm9, %v987_v18  ;;  %v1542_v24 = vld [vmem:[%s1964_s10 + $0xfc] sm:$0xff]  ;;  %v937_v7 = vsel %vm930_vm5, %v920_v6, %v635_v19 }
 0x106   : > { %524 = vrot.lane.b32.xlu0 %v2330_v25, %s1858_s21 }
 0x107   : > { %v2428_v13 = vpop.permute.xlu1 %446 }
 0x108   : > { %v2430_v23 = vpop.permute.xlu0 %384  ;;  %v888_v0 = vsel %vm879_vm2, %v871_v11, %v2428_v13 }
 0x109   : > { %838 = vrot.lane.b32.xlu1 %v1541_v20, %s1863_s7  ;;  %v872_v12 = vsel %vm862_vm1, %v2026_v22, %v2430_v23 }
 0x10a   : > { %776 = vrot.lane.b32.xlu0 %v1526_v21, %s1862_s29 }
 0x10b   : > { %v699_v27 = vpop.permute.xlu1 %698 }
 0x10c   : > { %v637_v61 = vpop.permute.xlu0 %636  ;;  %v954_v17 = vsel %vm947_vm6, %v937_v7, %v699_v27 }
 0x10d   : > { %650 = vrot.lane.b32.xlu1 %v2351_v31, %s1860_s27  ;;  %v1528_v31 = vld [vmem:[%s1964_s10 + $0x112] sm:$0xff]  ;;  %v938_v51 = vsel %vm930_vm5, %v921_v59, %v637_v61 }
 0x10e   : > { %588 = vrot.lane.b32.xlu0 %v2354_v38, %s1859_s24  ;;  %v1527_v38 = vld [vmem:[%s1964_s10 + $0x10a] sm:$0xff]  ;;  %s2565_s10 = sand.u32 1, %s1830_s13   ;;  %s1572_s24 = sshll.u32 %s1838_s15, 4 }
 0x10f   : > { %v511_v25 = vpop.permute.xlu1 %510  ;;  %s1440_s20 = sshll.u32 %s2565_s10, 7  ;;  %s1279_s5 = scalar_lea.sflag [#allocation3], %s2565_s10 }
 0x110   : > { %v2439_v10 = vpop.permute.xlu0 %448  ;;  %v905_v3 = vsel %vm896_vm3, %v888_v0, %v511_v25  ;;  %s2569_s21 = scalar_lea.vmem [#allocation2], %s1440_s20  ;;  %s1864_s20 = smov [#allocation2]  }
 0x111   : > { %652 = vrot.lane.b32.xlu1 %v1540_v29, %s1860_s27  ;;  %v889_v4 = vsel %vm879_vm2, %v872_v12, %v2439_v10  ;;  %s1566_s27 = sshll.u32 %s1842_s16, 5  ;;  %s1300_s8 = sshll.u32 %s2569_s21, 4  ;;  %s2588_s8 = int_to_ptr.vmem [resolvable:$true] %s1300_s8 }
 0x112   : > { %840 = vrot.lane.b32.xlu0 %v1542_v24, %s1863_s7 }
 0x113   : > { %v763_v34 = vpop.permute.xlu1 %762 }
 0x114   : > { %v701_v36 = vpop.permute.xlu0 %700  ;;  %v971_v45 = vsel %vm964_vm7, %v954_v17, %v763_v34 }
 0x115   : > { %716 = vrot.lane.b32.xlu1 %v1512_v44, %s1861_s6  ;;  %v955_v26 = vsel %vm947_vm6, %v938_v51, %v701_v36 }
 0x116   : > { %714 = vrot.lane.b32.xlu0 %v1511_v2, %s1861_s6  ;;  %s1297_s6 = sadd.s32 %s1572_s24, %s1566_s27  ;;  %s1732_s24 = sshll.u32 %s1864_s20, 4  ;;  %s1733_s24 = int_to_ptr.vmem [resolvable:$false] %s1732_s24 }
 0x117   : > { %v575_v48 = vpop.permute.xlu1 %574  ;;  %s1567_s9 = sshll.u32 %s1297_s6, 7  ;;  %s1734_s27 = scalar_lea.vmem %s1733_s24, 4096 }
 0x118   : > { %v513_v29 = vpop.permute.xlu0 %512  ;;  %v922_v18 = vsel %vm913_vm4, %v905_v3, %v575_v48  ;;  %s2593_s4 = scalar_lea.hbm %s2684_s2, %s1567_s9  ;;  %p1735_p2 = scmp.lt.s32.totalorder %s2588_s8, %s1733_s24 }
 0x119   : > { %780 = vrot.lane.b32.xlu1 %v1528_v31, %s1862_s29  ;;  %v906_v13 = vsel %vm896_vm3, %v889_v4, %v513_v29 }
 0x11a   : > { %778 = vrot.lane.b32.xlu0 %v1527_v38, %s1862_s29 }
 0x11b   : > { %v827_v52 = vpop.permute.xlu1 %826 }
 0x11c   : > { %v765_v50 = vpop.permute.xlu0 %764  ;;  %v988_v56 = vsel %vm981_vm8, %v971_v45, %v827_v52 }
 0x11d   : > { %844 = vrot.lane.b32.xlu1 %v1544_v30, %s1863_s7  ;;  %1613 = vmatprep.mubr.msk.f32.mxu0 %vm1003_vm9, %v988_v56  ;;  %v972_v46 = vsel %vm964_vm7, %v955_v26, %v765_v50 }
 0x11e   : > { %842 = vrot.lane.b32.xlu0 %v1543_v8, %s1863_s7  ;;  %s1728_s7 = scalar_lea.vmem %s2588_s8, 2048 }
 0x11f   : > { %v577_v33 = vpop.permute.xlu1 %576  ;;  %p1729_p13 = scmp.ne.s32.totalorder %s2588_s8, %s1728_s7  ;;  %p1736_p4 = scmp.lt.s32.totalorder %s1734_s27, %s1728_s7 }
 0x120   : > { %v387_v58 = vpop.permute.xlu0 %386  ;;  %v923_v34 = vsel %vm913_vm4, %v906_v13, %v577_v33 }
 0x121   : > { %v873_v30 = vsel %vm862_vm1, %v2056_v32, %v387_v58  ;;  %p1730_p0 = pnand %p1729_p13, %p1938_p3  ;;  %p1737_p5 = por %p1736_p4, %p1735_p2 }
 0x123   : > { %v829_v63 = vpop.permute.xlu1 %828  ;;  %p1731_p1 = pneg %p1730_p0 }
 0x124   : > { %v639_v15 = vpop.permute.xlu0 %638  ;;  %v989_v54 = vsel %vm981_vm8, %v972_v46, %v829_v63 }
 0x125   : > { %1614 = vmatmul.mubr.msk.f32.gmra.mrb[6].mxu0 %vm1003_vm9, %v989_v54  ;;  %v939_v20 = vsel %vm930_vm5, %v922_v18, %v639_v15  ;;  %p1738_p6 = pnand %p1737_p5, %p1731_p1 }
 0x127   : > { %v451_v57 = vpop.permute.xlu1 %450 }
 0x128   : > { %v389_v62 = vpop.permute.xlu0 %388  ;;  %v890_v8 = vsel %vm879_vm2, %v873_v30, %v451_v57 }
 0x129   : > { %v874_v32 = vsel %vm862_vm1, %v2069_v35, %v389_v62 }
 0x12b   : > { %v703_v16 = vpop.permute.xlu1 %702 }
 0x12c   : > { %v641_v40 = vpop.permute.xlu0 %640  ;;  %v956_v21 = vsel %vm947_vm6, %v939_v20, %v703_v16 }
 0x12d   : > { %v940_v36 = vsel %vm930_vm5, %v923_v34, %v641_v40 }
 0x12f   : > { %v515_v42 = vpop.permute.xlu1 %514 }
 0x130   : > { %v453_v43 = vpop.permute.xlu0 %452  ;;  %v907_v45 = vsel %vm896_vm3, %v890_v8, %v515_v42 }
 0x131   : > { %v891_v58 = vsel %vm879_vm2, %v874_v32, %v453_v43 }
 0x133   : > { %v767_v55 = vpop.permute.xlu1 %766 }
 0x134   : > { %v705_v60 = vpop.permute.xlu0 %704  ;;  %v973_v27 = vsel %vm964_vm7, %v956_v21, %v767_v55 }
 0x135   : > { %v957_v14 = vsel %vm947_vm6, %v940_v36, %v705_v60 }
 0x137   : > { %v579_v1 = vpop.permute.xlu1 %578 }
 0x138   : > { %v517_v19 = vpop.permute.xlu0 %516  ;;  %v924_v56 = vsel %vm913_vm4, %v907_v45, %v579_v1 }
 0x139   : > { %v908_v26 = vsel %vm896_vm3, %v891_v58, %v517_v19 }
 0x13b   : > { %v831_v61 = vpop.permute.xlu1 %830 }
 0x13c   : > { %v769_v24 = vpop.permute.xlu0 %768  ;;  %v990_v44 = vsel %vm981_vm8, %v973_v27, %v831_v61 }
 0x13d   : > { %1616 = vmatprep.mubr.msk.f32.mxu1 %vm1003_vm9, %v990_v44  ;;  %v974_v37 = vsel %vm964_vm7, %v957_v14, %v769_v24 }
 0x13f   : > { %v581_v25 = vpop.permute.xlu1 %580 }
 0x140   : > { %v391_v2 = vpop.permute.xlu0 %390  ;;  %v925_v15 = vsel %vm913_vm4, %v908_v26, %v581_v25 }
 0x141   : > { %v875_v19 = vsel %vm862_vm1, %v2100_v39, %v391_v2 }
 0x143   : > { %v833_v31 = vpop.permute.xlu1 %832 }
 0x144   : > { %v643_v38 = vpop.permute.xlu0 %642  ;;  %v991_v22 = vsel %vm981_vm8, %v974_v37, %v833_v31 }
 0x145   : > { %1617 = vmatmul.mubr.msk.f32.vlgmr.msra.gmra.mrb[0].mxu1 %vm1003_vm9, %v991_v22  ;;  %v941_v9 = vsel %vm930_vm5, %v924_v56, %v643_v38 }
 0x147   : > { %v455_v23 = vpop.permute.xlu1 %454 }
 0x148   : > { %v393_v10 = vpop.permute.xlu0 %392  ;;  %v892_v18 = vsel %vm879_vm2, %v875_v19, %v455_v23 }
 0x149   : > { %v876_v39 = vsel %vm862_vm1, %v2112_v41, %v393_v10 }
 0x14b   : > { %v707_v28 = vpop.permute.xlu1 %706 }
 0x14c   : > { %v645_v48 = vpop.permute.xlu0 %644  ;;  %v958_v49 = vsel %vm947_vm6, %v941_v9, %v707_v28 }
 0x14d   : > { %v942_v54 = vsel %vm930_vm5, %v925_v15, %v645_v48 }
 0x14f   : > { %v519_v29 = vpop.permute.xlu1 %518 }
 0x150   : > { %v457_v6 = vpop.permute.xlu0 %456  ;;  %v909_v20 = vsel %vm896_vm3, %v892_v18, %v519_v29 }
 0x151   : > { %v893_v2 = vsel %vm879_vm2, %v876_v39, %v457_v6 }
 0x153   : > { %v771_v7 = vpop.permute.xlu1 %770 }
 0x154   : > { %v709_v17 = vpop.permute.xlu0 %708  ;;  %v975_v5 = vsel %vm964_vm7, %v958_v49, %v771_v7 }
 0x155   : > { %v959_v57 = vsel %vm947_vm6, %v942_v54, %v709_v17 }
 0x157   : > { %v583_v52 = vpop.permute.xlu1 %582 }
 0x158   : > { %v521_v50 = vpop.permute.xlu0 %520  ;;  %v926_v61 = vsel %vm913_vm4, %v909_v20, %v583_v52 }
 0x159   : > { %v910_v34 = vsel %vm896_vm3, %v893_v2, %v521_v50 }
 0x15b   : > { %v835_v33 = vpop.permute.xlu1 %834 }
 0x15c   : > { %v773_v59 = vpop.permute.xlu0 %772  ;;  %v992_v51 = vsel %vm981_vm8, %v975_v5, %v835_v33 }
 0x15d   : > { %1619 = vmatprep.mubr.msk.f32.mxu1 %vm1003_vm9, %v992_v51  ;;  %v976_v16 = vsel %vm964_vm7, %v959_v57, %v773_v59 }
 0x15f   : > { %v585_v46 = vpop.permute.xlu1 %584 }
 0x160   : > { %v395_v63 = vpop.permute.xlu0 %394  ;;  %v927_v37 = vsel %vm913_vm4, %v910_v34, %v585_v46 }
 0x161   : > { %v877_v29 = vsel %vm862_vm1, %v2146_v47, %v395_v63 }
 0x163   : > { %v837_v40 = vpop.permute.xlu1 %836 }
 0x164   : > { %v647_v42 = vpop.permute.xlu0 %646  ;;  %v993_v35 = vsel %vm981_vm8, %v976_v16, %v837_v40 }
 0x165   : > { %1620 = vmatmul.mubr.msk.f32.gmra.mrb[2].mxu1 %vm1003_vm9, %v993_v35  ;;  %v943_v24 = vsel %vm930_vm5, %v926_v61, %v647_v42 }
 0x167   : > { %v459_v62 = vpop.permute.xlu1 %458 }
 0x168   : > { %v397_v43 = vpop.permute.xlu0 %396  ;;  %v894_v7 = vsel %vm879_vm2, %v877_v29, %v459_v62 }
 0x169   : > { %v878_v6 = vsel %vm862_vm1, %v2163_v53, %v397_v43 }
 0x16b   : > { %v711_v55 = vpop.permute.xlu1 %710 }
 0x16c   : > { %v649_v60 = vpop.permute.xlu0 %648  ;;  %v960_v44 = vsel %vm947_vm6, %v943_v24, %v711_v55 }
 0x16d   : > { %v944_v31 = vsel %vm930_vm5, %v927_v37, %v649_v60 }
 0x16f   : > { %v523_v11 = vpop.permute.xlu1 %522 }
 0x170   : > { %v461_v0 = vpop.permute.xlu0 %460  ;;  %v911_v30 = vsel %vm896_vm3, %v894_v7, %v523_v11 }
 0x171   : > { %v895_v17 = vsel %vm879_vm2, %v878_v6, %v461_v0 }
 0x173   : > { %v775_v3 = vpop.permute.xlu1 %774 }
 0x174   : > { %v713_v1 = vpop.permute.xlu0 %712  ;;  %v977_v12 = vsel %vm964_vm7, %v960_v44, %v775_v3 }
 0x175   : > { %v961_v38 = vsel %vm947_vm6, %v944_v31, %v713_v1 }
 0x177   : > { %v587_v21 = vpop.permute.xlu1 %586 }
 0x178   : > { %v525_v27 = vpop.permute.xlu0 %524  ;;  %v928_v50 = vsel %vm913_vm4, %v911_v30, %v587_v21 }
 0x179   : > { %v912_v8 = vsel %vm896_vm3, %v895_v17, %v525_v27 }
 0x17b   : > { %v839_v4 = vpop.permute.xlu1 %838 }
 0x17c   : > { %v777_v13 = vpop.permute.xlu0 %776  ;;  %v994_v25 = vsel %vm981_vm8, %v977_v12, %v839_v4 }
 0x17d   : > { %1622 = vmatprep.mubr.msk.f32.mxu1 %vm1003_vm9, %v994_v25  ;;  %v978_v22 = vsel %vm964_vm7, %v961_v38, %v777_v13 }
 0x17f   : > { %v651_v36 = vpop.permute.xlu1 %650 }
 0x180   : > { %v589_v14 = vpop.permute.xlu0 %588  ;;  %v945_v47 = vsel %vm930_vm5, %v928_v50, %v651_v36 }
 0x181   : > { %v929_v56 = vsel %vm913_vm4, %v912_v8, %v589_v14 }
 0x183   : > { %v653_v23 = vpop.permute.xlu1 %652 }
 0x184   : > { %v841_v28 = vpop.permute.xlu0 %840  ;;  %v946_v9 = vsel %vm930_vm5, %v929_v56, %v653_v23 }
 0x185   : > { %v995_v41 = vsel %vm981_vm8, %v978_v22, %v841_v28 }
 0x186   : > { %1623 = vmatmul.mubr.msk.f32.gmra.mrb[4].mxu1 %vm1003_vm9, %v995_v41 }
 0x187   : > { %v717_v10 = vpop.permute.xlu1 %716 }
 0x188   : > { %v715_v48 = vpop.permute.xlu0 %714  ;;  %v963_v53 = vsel %vm947_vm6, %v946_v9, %v717_v10 }
 0x189   : > { %v962_v49 = vsel %vm947_vm6, %v945_v47, %v715_v48 }
 0x18b   : > { %v781_v45 = vpop.permute.xlu1 %780 }
 0x18c   : > { %v779_v52 = vpop.permute.xlu0 %778  ;;  %v980_v5 = vsel %vm964_vm7, %v963_v53, %v781_v45 }
 0x18d   : > { %v979_v33 = vsel %vm964_vm7, %v962_v49, %v779_v52 }
 0x18f   : > { %v845_v59 = vpop.permute.xlu1 %844 }
 0x190   : > { %v843_v51 = vpop.permute.xlu0 %842  ;;  %v997_v32 = vsel %vm981_vm8, %v980_v5, %v845_v59 }
 0x191   : > { %v996_v58 = vsel %vm981_vm8, %v979_v33, %v843_v51 }
 0x192   : > { %1625 = vmatprep.mubr.msk.f32.mxu1 %vm1003_vm9, %v996_v58 }
 0x193   : > { %1626 = vmatmul.mubr.msk.f32.gmra.mrb[6].mxu1 %vm1003_vm9, %v997_v32 }
 0x198   : > { %v1606_v26 = vpop.f32.mrb[0].mxu0 }
 0x199   : > { %1202 = vst [vmem:[%s2569_s21 + $0x8] sm:$0xff] %v1606_v26  ;;  %v1239_v46 = vmul.f32 %v1606_v26, %v1606_v26  ;;  %v1122_v63 = vpop.f32.mrb[1].mxu0 }
 0x19a   : > { %1201 = vst [vmem:[%s2569_s21] sm:$0xff] %v1122_v63  ;;  %v1217_v15 = vadd.f32 %v1606_v26, %v1122_v63  ;;  %v1238_v54 = vmul.f32 %v1122_v63, %v1122_v63 }
 0x19c   : > { %v1254_v57 = vadd.f32 %v1239_v46, %v1238_v54 }
 0x1b8   : > { %v1609_v16 = vpop.f32.mrb[2].mxu0 }
 0x1b9   : > { %1204 = vst [vmem:[%s2569_s21 + $0x18] sm:$0xff] %v1609_v16  ;;  %v1132_v40 = vpop.f32.mrb[3].mxu0  ;;  %v1241_v62 = vmul.f32 %v1609_v16, %v1609_v16 }
 0x1ba   : > { %1203 = vst [vmem:[%s2569_s21 + $0x10] sm:$0xff] %v1132_v40  ;;  %v1218_v42 = vadd.f32 %v1217_v15, %v1132_v40  ;;  %v1240_v35 = vmul.f32 %v1132_v40, %v1132_v40 }
 0x1bc   : > { %v1255_v43 = vadd.f32 %v1254_v57, %v1240_v35  ;;  %v1219_v55 = vadd.f32 %v1609_v16, %v1218_v42 }
 0x1be   : > { %v1256_v60 = vadd.f32 %v1255_v43, %v1241_v62 }
 0x1d8   : > { %v1612_v11 = vpop.f32.mrb[4].mxu0 }
 0x1d9   : > { %1206 = vst [vmem:[%s2569_s21 + $0x28] sm:$0xff] %v1612_v11  ;;  %v1142_v0 = vpop.f32.mrb[5].mxu0  ;;  %v1243_v19 = vmul.f32 %v1612_v11, %v1612_v11 }
 0x1da   : > { %1205 = vst [vmem:[%s2569_s21 + $0x20] sm:$0xff] %v1142_v0  ;;  %v1220_v3 = vadd.f32 %v1219_v55, %v1142_v0  ;;  %v1242_v1 = vmul.f32 %v1142_v0, %v1142_v0 }
 0x1dc   : > { %v1257_v18 = vadd.f32 %v1256_v60, %v1242_v1  ;;  %v1221_v20 = vadd.f32 %v1612_v11, %v1220_v3 }
 0x1de   : > { %v1258_v21 = vadd.f32 %v1257_v18, %v1243_v19 }
 0x1f8   : > { %v1615_v27 = vpop.f32.mrb[6].mxu0 }
 0x1f9   : > { %1208 = vst [vmem:[%s2569_s21 + $0x38] sm:$0xff] %v1615_v27  ;;  %v1152_v61 = vpop.f32.mrb[7].mxu0  ;;  %v1245_v12 = vmul.f32 %v1615_v27, %v1615_v27 }
 0x1fa   : > { %1207 = vst [vmem:[%s2569_s21 + $0x30] sm:$0xff] %v1152_v61  ;;  %v1222_v24 = vadd.f32 %v1221_v20, %v1152_v61  ;;  %v1244_v44 = vmul.f32 %v1152_v61, %v1152_v61 }
 0x1fc   : > { %v1223_v4 = vadd.f32 %v1615_v27, %v1222_v24  ;;  %v1259_v13 = vadd.f32 %v1258_v21, %v1244_v44 }
 0x1fe   : > { %v1260_v25 = vadd.f32 %v1259_v13, %v1245_v12 }
 0x218   : > { %v1618_v39 = vpop.f32.mrb[0].mxu1 }
 0x219   : > { %1210 = vst [vmem:[%s2569_s21 + $0x48] sm:$0xff] %v1618_v39  ;;  %v1162_v2 = vpop.f32.mrb[1].mxu1  ;;  %v1247_v14 = vmul.f32 %v1618_v39, %v1618_v39 }
 0x21a   : > { %1209 = vst [vmem:[%s2569_s21 + $0x40] sm:$0xff] %v1162_v2  ;;  %v1224_v34 = vadd.f32 %v1223_v4, %v1162_v2  ;;  %v1246_v36 = vmul.f32 %v1162_v2, %v1162_v2 }
 0x21c   : > { %v1261_v37 = vadd.f32 %v1260_v25, %v1246_v36  ;;  %v1225_v31 = vadd.f32 %v1618_v39, %v1224_v34 }
 0x21e   : > { %v1262_v38 = vadd.f32 %v1261_v37, %v1247_v14 }
 0x238   : > { %v1621_v22 = vpop.f32.mrb[2].mxu1 }
 0x239   : > { %1212 = vst [vmem:[%s2569_s21 + $0x58] sm:$0xff] %v1621_v22  ;;  %v1172_v23 = vpop.f32.mrb[3].mxu1  ;;  %v1249_v10 = vmul.f32 %v1621_v22, %v1621_v22 }
 0x23a   : > { %1211 = vst [vmem:[%s2569_s21 + $0x50] sm:$0xff] %v1172_v23  ;;  %v1226_v28 = vadd.f32 %v1225_v31, %v1172_v23  ;;  %v1248_v41 = vmul.f32 %v1172_v23, %v1172_v23 }
 0x23c   : > { %v1263_v48 = vadd.f32 %v1262_v38, %v1248_v41  ;;  %v1227_v29 = vadd.f32 %v1621_v22, %v1226_v28 }
 0x23e   : > { %v1264_v6 = vadd.f32 %v1263_v48, %v1249_v10 }
 0x259   : > { %v1624_v7 = vpop.f32.mrb[4].mxu1 }
 0x25a   : > { %1214 = vst [vmem:[%s2569_s21 + $0x68] sm:$0xff] %v1624_v7  ;;  %v1182_v17 = vpop.f32.mrb[5].mxu1  ;;  %v1251_v45 = vmul.f32 %v1624_v7, %v1624_v7 }
 0x25b   : > { %1213 = vst [vmem:[%s2569_s21 + $0x60] sm:$0xff] %v1182_v17  ;;  %v1228_v30 = vadd.f32 %v1227_v29, %v1182_v17  ;;  %v1250_v8 = vmul.f32 %v1182_v17, %v1182_v17 }
 0x25d   : > { %v1265_v52 = vadd.f32 %v1264_v6, %v1250_v8  ;;  %v1229_v50 = vadd.f32 %v1624_v7, %v1228_v30 }
 0x25f   : > { %v1266_v56 = vadd.f32 %v1265_v52, %v1251_v45 }
 0x266   : > { %v1627_v47 = vpop.f32.mrb[6].mxu1 }
 0x267   : > { %1216 = vst [vmem:[%s2569_s21 + $0x78] sm:$0xff] %v1627_v47  ;;  %v1192_v9 = vpop.f32.mrb[7].mxu1 }
 0x268   : > { %1215 = vst [vmem:[%s2569_s21 + $0x70] sm:$0xff] %v1192_v9  ;;  %v1230_v53 = vadd.f32 %v1229_v50, %v1192_v9  ;;  %v1252_v49 = vmul.f32 %v1192_v9, %v1192_v9 }
 0x269   : > { %1741 = shalt.err (!%p1738_p6)
}
 0x26a   : > { %s1742_s21 = scalar_lea.hbm %s2593_s4, 2048  ;;  %s1746_s28 = scalar_lea.hbm %s2684_s2, 8192 }
 0x26b   : > { %p1743_p7 = scmp.ne.s32.totalorder %s2593_s4, %s1742_s21  ;;  %p1747_p11 = scmp.lt.u32.totalorder %s2593_s4, %s2684_s2 }
 0x26c   : > { %p1748_p12 = scmp.lt.u32.totalorder %s1746_s28, %s1742_s21  ;;  %p1750_p0 = scmp.lt.u32.totalorder %s1742_s21, %s2593_s4 }
 0x26d   : > { %p1744_p9 = pnand %p1743_p7, %p1938_p3 }
 0x26e   : > { %p1749_p13 = por %p1748_p12, %p1747_p11 }
 0x26f   : > { %p1745_p10 = pneg %p1744_p9 }
 0x270   : > { %p1751_p1 = por %p1750_p0, %p1749_p13 }
 0x272   : > { %p1752_p2 = pnand %p1751_p1, %p1745_p10 }
 0x274   : > { %1755 = shalt.err (!%p1752_p2)
}
 0x275   : > { %s1865_s7 = smov 128   ;;  %v1253_v5 = vmul.f32 %v1627_v47, %v1627_v47  ;;  %v1231_v33 = vadd.f32 %v1627_v47, %v1230_v53  ;;  %v1267_v59 = vadd.f32 %v1266_v56, %v1252_v49  ;;  %s1441_s24 = sshll.u32 %s2565_s10, 1  ;;  %vm1275_vm10 = vcmask 1040384  }
 0x276   : > { %1643 = dma.vmem_to_hbm [thread:$0]  (%p1938_p3), %s2588_s8, 2048, %s2593_s4, %s1279_s5, %s1865_s7, %s1865_s7, %s1856_s11  }
 0x277   : > { %v1232_v51 = vrot.slane %v1231_v33, 4  ;;  %v1268_v32 = vadd.f32 %v1267_v59, %v1253_v5  ;;  %s1568_s27 = sshll.u32 %s1842_s16, 1  ;;  %s190_s8 = scalar_lea.vmem [#allocation4], %s1441_s24 }
 0x278   : > { %s1314_s21 = sadd.s32 %s1838_s15, %s1568_s27  ;;  %s1318_s4 = sshll.u32 %s190_s8, 4  ;;  %s2630_s4 = int_to_ptr.vmem [resolvable:$true] %s1318_s4 }
 0x279   : > { %v1233_v58 = vadd.f32 %v1232_v51, %v1231_v33  ;;  %v1269_v26 = vrot.slane %v1268_v32, 4  ;;  %s1569_s11 = sshll.u32 %s1314_s21, 5  ;;  %s1284_s15 = scalar_lea.sflag [#allocation5], %s2565_s10 }
 0x27a   : > { %s2628_s9 = scalar_lea.hbm %s2685_s3, %s1569_s11  ;;  %s1756_s16 = scalar_lea.vmem %s2630_s4, 32 }
 0x27b   : > { %v1234_v46 = vrot.slane %v1233_v58, 2  ;;  %v1270_v63 = vadd.f32 %v1269_v26, %v1268_v32  ;;  %p1757_p4 = scmp.ne.s32.totalorder %s2630_s4, %s1756_s16  ;;  %s1866_s28 = smov [#allocation4]  }
 0x27c   : > { %s1760_s29 = sshll.u32 %s1866_s28, 4  ;;  %s1761_s29 = int_to_ptr.vmem [resolvable:$false] %s1760_s29 }
 0x27d   : > { %v1235_v15 = vadd.f32 %v1234_v46, %v1233_v58  ;;  %v1271_v54 = vrot.slane %v1270_v63, 2  ;;  %p1758_p5 = pnand %p1757_p4, %p1938_p3  ;;  %s1762_s20 = scalar_lea.vmem %s1761_s29, 64 }
 0x27e   : > { %p1763_p7 = scmp.lt.s32.totalorder %s2630_s4, %s1761_s29  ;;  %p1764_p9 = scmp.lt.s32.totalorder %s1762_s20, %s1756_s16 }
 0x27f   : > { %v1236_v57 = vrot.slane %v1235_v15, 1  ;;  %v1272_v16 = vadd.f32 %v1271_v54, %v1270_v63  ;;  %p1759_p6 = pneg %p1758_p5 }
 0x280   : > { %p1765_p10 = por %p1764_p9, %p1763_p7 }
 0x281   : > { %v1273_v40 = vrot.slane %v1272_v16, 1  ;;  %v1237_v42 = vadd.f32 %v1236_v57, %v1235_v15 }
 0x282   : > { %p1766_p11 = pnand %p1765_p10, %p1759_p6 }
 0x283   : > { %v1274_v35 = vadd.f32 %v1273_v40, %v1272_v16 }
 0x285   : > { %v1276_v62 = vsel %vm1275_vm10, %v1237_v42, %v1274_v35 }
 0x286   : > { %1277 = vst [vmem:[%s190_s8] sm:$0x3] %v1276_v62 }
 0x287   : > { %1769 = shalt.err (!%p1766_p11)
}
 0x288   : > { %s1770_s10 = scalar_lea.hbm %s2628_s9, 32  ;;  %s1774_s27 = scalar_lea.hbm %s2685_s3, 128 }
 0x289   : > { %p1771_p12 = scmp.ne.s32.totalorder %s2628_s9, %s1770_s10  ;;  %p1775_p1 = scmp.lt.u32.totalorder %s2628_s9, %s2685_s3 }
 0x28a   : > { %p1776_p2 = scmp.lt.u32.totalorder %s1774_s27, %s1770_s10  ;;  %p1778_p5 = scmp.lt.u32.totalorder %s1770_s10, %s2628_s9 }
 0x28b   : > { %p1772_p13 = pnand %p1771_p12, %p1938_p3 }
 0x28c   : > { %p1777_p4 = por %p1776_p2, %p1775_p1 }
 0x28d   : > { %p1773_p0 = pneg %p1772_p13 }
 0x28e   : > { %p1779_p6 = por %p1778_p5, %p1777_p4 }
 0x290   : > { %p1780_p7 = pnand %p1779_p6, %p1773_p0 }
 0x292   : > { %1783 = shalt.err (!%p1780_p7)
}
 0x293   : > { %1644 = dma.vmem_to_hbm [thread:$0]  (%p1938_p3), %s2630_s4, 32, %s2628_s9, %s1284_s15  }
 0x294 PF: > { %p1654_p9 = scmp.ge.s32.totalorder %s1854_s19, 2  ;;  %s1330_s8 = sand.u32 1, %s1826_s12  }
 0x295   : > { %s1331_s5 = scalar_lea.sflag [#allocation3], %s1330_s8 }
 0x296   : > { %p1648_p10 = pnand %p1654_p9, %p1947_p8 }
 0x298   : > { %1817 = dma.done.wait (!%p1648_p10), %s1331_s5, 2048  }
 0x299   : > { %1819 = vsyncadd (!%p1648_p10), %s1331_s5, 4294965248  ;;  %s1340_s6 = scalar_lea.sflag [#allocation5], %s1330_s8 }
 0x29a   : > { %1821 = dma.done.wait (!%p1648_p10), %s1340_s6, 32  }
 0x29b   : > { %1823 = vsyncadd (!%p1648_p10), %s1340_s6, 4294967264  ;;  %s20_s19 = sadd.s32 1, %s1854_s19   ;;  %s2688_s12 = smov %s1830_s13 }
 0x29c   : > { %p17_p11 = scmp.ge.s32.totalorder %s20_s19, 6   ;;  %s2689_s13 = smov %s1834_s14 }
 0x29d   : > { %s2690_s14 = smov %s1956_s30  ;;  %s2691_s15 = smov %s1846_s17 }
 0x29e   : > { %s2692_s16 = smov %s1850_s18  ;;  %s2693_s17 = smov %s2696_s22 }
 0x29f   : > { %s2694_s18 = smov %s2700_s23  ;;  %19 = sbr.rel (!%p17_p11) target bundleno = 7 (0x7), region = 83 }
 0x2a6   :  { %1345 = vsyncpa [#allocation3], 1 }
 0x2a7   :  { %1347 = vsyncpa [#allocation3 + $0x1], 1 }
 0x2a8   :  { %1348 = vsyncpa [#allocation5], 1 }
 0x2a9   :  { %1350 = vsyncpa [#allocation5 + $0x1], 1 }

</bundles_post_ra>
